<compile_context>
chip_gen: v7x
topology: tpu7x:2x2x1
jax: 0.10.0
libtpu: 0.0.40
codegen_flags: <defaults>
</compile_context>

<pallas_src>
import jax
import jax.numpy as jnp
from jax.experimental import pallas as pl
from jax.experimental.pallas import tpu as pltpu


def _round_up(x: int, m: int) -> int:
    return (x + m - 1) // m * m


def _cdiv(a: int, b: int) -> int:
    return (a + b - 1) // b


def _choose_b_blk(n: int, c: int, want: int) -> int:
    """Largest b <= want that divides n with (b*c) % 8 == 0; else the full axis (always legal)."""
    for b in range(min(n, max(want, 1)), 0, -1):
        if n % b == 0 and (b * c) % 8 == 0:
            return b
    return n


def _pw_se_kernel(x_ref, w1_ref, b1_ref, w2_ref, b2_ref, o_ref):
    # x_ref:  (Cb, T)  Cb = B_blk*C channel rows (possibly several batch elems), T spatial lanes
    # w1_ref: (Hb, Cb) block-diagonal conv_reduce weight, in the activation dtype
    # b1_ref: (Hb, 1)  f32 bias (hidden zero-padded to a multiple of 8)
    # w2_ref: (Cb, Hb) block-diagonal conv_expand weight, in the activation dtype
    # b2_ref: (Cb, 1)  f32 bias
    # o_ref:  (Cb, T)
    x = x_ref[...]                                   # native dtype — no f32 copy of x

    # 1x1 conv_reduce + ReLU:  (Hb, Cb) @ (Cb, T) -> (Hb, T), f32 accumulation on the MXU.
    h = jnp.dot(w1_ref[...], x, preferred_element_type=jnp.float32) + b1_ref[...]
    h = jnp.maximum(h, 0.0).astype(w2_ref.dtype)

    # 1x1 conv_expand:         (Cb, Hb) @ (Hb, T) -> (Cb, T)
    s = jnp.dot(w2_ref[...], h, preferred_element_type=jnp.float32) + b2_ref[...]

    # Divide-free sigmoid: one EUP tanh + cheap VALU ops.
    gate = 0.5 * (jnp.tanh(0.5 * s) + 1.0)

    # Gate multiply in the activation dtype (bf16 on the bf16 path), store in output dtype.
    o_ref[...] = (x * gate.astype(x.dtype)).astype(o_ref.dtype)


def pw_squeeze_excite(x_nchw, w_reduce, b_reduce, w_expand, b_expand,
                      *, target_step_bytes: int = 2 << 20):
    """
    x_nchw:   (N, C, H, W)   f32 or bf16; output keeps the dtype.
    w_reduce: (hidden, C)    Conv2d(C, hidden, 1).weight squeezed
    b_reduce: (hidden,)
    w_expand: (C, hidden)    Conv2d(hidden, C, 1).weight squeezed
    b_expand: (C,)
    """
    N, C, H, W = x_nchw.shape
    Hc = w_reduce.shape[0]
    HW = H * W
    itemsize = jnp.dtype(x_nchw.dtype).itemsize

    # ---------------- tiling ----------------
    hw128 = _round_up(HW, 128)
    # Lane tile: as much of H*W as fits ~target_step_bytes of x for a single image.
    max_lane = max(128, (target_step_bytes // max(C * itemsize, 1)) // 128 * 128)
    tile_hw = min(hw128, max_lane)
    n_hw = _cdiv(HW, tile_hw)
    # Batch folding: if one image is far below the per-step target, pack several per step.
    want_b = max(1, target_step_bytes // (C * tile_hw * itemsize)) if n_hw == 1 else 1
    b_blk = _choose_b_blk(N, C, want_b)
    # Keep per-step VMEM bounded if the C%8!=0 fallback picked a large batch block.
    if b_blk * C * tile_hw * itemsize > 4 * target_step_bytes and tile_hw > 128:
        tile_hw = max(128, ((4 * target_step_bytes) // (b_blk * C * itemsize)) // 128 * 128)
        n_hw = _cdiv(HW, tile_hw)
    # v7x megacore: guarantee >=2 parallel grid steps when there is enough work to split.
    if (N // b_blk) * n_hw == 1 and N * C * HW * itemsize >= (1 << 20):
        if b_blk % 2 == 0 and ((b_blk // 2) * C) % 8 == 0:
            b_blk //= 2
        elif tile_hw >= 256:
            tile_hw = _round_up(tile_hw // 2, 128)
            n_hw = _cdiv(HW, tile_hw)

    Cb = b_blk * C
    Hp = max(8, _round_up(Hc, 8))        # hidden padded to a multiple of 8 sublanes (exact no-op)
    Hb = b_blk * Hp
    grid = (N // b_blk, n_hw)

    # ---------------- parameters (folded into the jit graph; see __main__) ----------------
    f32 = jnp.float32
    w1 = jnp.zeros((Hp, C), f32).at[:Hc, :].set(w_reduce.astype(f32))
    b1 = jnp.zeros((Hp,), f32).at[:Hc].set(b_reduce.astype(f32))
    w2 = jnp.zeros((C, Hp), f32).at[:, :Hc].set(w_expand.astype(f32))
    b2 = b_expand.astype(f32)
    if b_blk > 1:
        eye = jnp.eye(b_blk, dtype=f32)
        w1 = jnp.kron(eye, w1)           # (Hb, Cb) block-diagonal: isolates the folded batches
        w2 = jnp.kron(eye, w2)           # (Cb, Hb)
        b1 = jnp.tile(b1, b_blk)
        b2 = jnp.tile(b2, b_blk)
    mxu_dt = x_nchw.dtype if x_nchw.dtype == jnp.bfloat16 else f32
    w1 = w1.astype(mxu_dt)
    w2 = w2.astype(mxu_dt)
    b1 = b1.reshape(Hb, 1)               # biases stay f32 (added to the f32 accumulator)
    b2 = b2.reshape(Cb, 1)

    # NCHW-contiguous -> (N*C, H*W): free reshape, no transpose, no padding, no extra HBM pass.
    x2 = x_nchw.reshape(N * C, HW)

    out2 = pl.pallas_call(
        _pw_se_kernel,
        out_shape=jax.ShapeDtypeStruct((N * C, HW), x_nchw.dtype),
        grid_spec=pltpu.PrefetchScalarGridSpec(
            num_scalar_prefetch=0,
            grid=grid,
            in_specs=[
                # x tile: Cb channel rows on sublanes, tile_hw lane-dense spatial lanes.
                # (If a profile shows exposed input DMA, add pipeline_mode=pl.Buffered(3).)
                pl.BlockSpec((Cb, tile_hw), lambda n, t: (n, t)),
                # Weights / biases: constant index_map -> resident across all grid steps.
                pl.BlockSpec((Hb, Cb), lambda n, t: (0, 0)),
                pl.BlockSpec((Hb, 1), lambda n, t: (0, 0)),
                pl.BlockSpec((Cb, Hb), lambda n, t: (0, 0)),
                pl.BlockSpec((Cb, 1), lambda n, t: (0, 0)),
            ],
            out_specs=pl.BlockSpec((Cb, tile_hw), lambda n, t: (n, t)),
        ),
        compiler_params=pltpu.CompilerParams(
            # Fully independent grid axes -> both TensorCores shard the work on v7x.
            dimension_semantics=("parallel", "parallel"),
            # No-op on v6e/v7x (32 MiB default scoped), raises v5e's 16 MiB default so the
            # ~2 MiB double-buffered tiles never collide with the scoped-VMEM limit.
            vmem_limit_bytes=32 * 1024 * 1024,
        ),
    )(x2, w1, b1, w2, b2)

    return out2.reshape(N, C, H, W)


def _reference(x_nchw, w_reduce, b_reduce, w_expand, b_expand):
    # Pure-JAX reference mirroring the PyTorch forward (1x1 convs as einsums, f32 compute).
    x = x_nchw.astype(jnp.float32)
    se = jnp.einsum("nchw,kc->nkhw", x, w_reduce) + b_reduce[None, :, None, None]
    se = jnp.maximum(se, 0.0)
    se = jnp.einsum("nkhw,ck->nchw", se, w_expand) + b_expand[None, :, None, None]
    return (x * jax.nn.sigmoid(se)).astype(x_nchw.dtype)


if __name__ == "__main__":
    key = jax.random.PRNGKey(0)
    k_x, k_w1, k_b1, k_w2, k_b2, k_x2 = jax.random.split(key, 6)

    # Module config: in_channels=16, ratio=0.25 -> hidden_channels = 4
    N, C, H, W = 2, 16, 16, 16
    Hc = int(0.25 * C)

    x = jax.random.normal(k_x, (N, C, H, W), dtype=jnp.float32)
    w_reduce = 0.1 * jax.random.normal(k_w1, (Hc, C), dtype=jnp.float32)
    b_reduce = 0.1 * jax.random.normal(k_b1, (Hc,), dtype=jnp.float32)
    w_expand = 0.1 * jax.random.normal(k_w2, (C, Hc), dtype=jnp.float32)
    b_expand = 0.1 * jax.random.normal(k_b2, (C,), dtype=jnp.float32)

    # jit folds the (tiny) weight padding / block-diagonal prep into one compiled graph.
    pw_se = jax.jit(pw_squeeze_excite, static_argnames=("target_step_bytes",))

    # 1) f32, small feature map -> batch-folded single step (grid (1, 1), Cb = 32 rows).
    ref = _reference(x, w_reduce, b_reduce, w_expand, b_expand)
    out = jax.block_until_ready(pw_se(x, w_reduce, b_reduce, w_expand, b_expand))
    assert out.shape == (N, C, H, W) and out.dtype == x.dtype
    assert jnp.allclose(out, ref, atol=1e-5, rtol=1e-5), "f32 mismatch vs reference"

    # 2) Multi-step grid with a ragged last lane tile (H*W = 2304, tile 1024 -> grid (2, 3)).
    x_big = jax.random.normal(k_x2, (2, C, 48, 48), dtype=jnp.float32)
    out2 = jax.block_until_ready(
        pw_se(x_big, w_reduce, b_reduce, w_expand, b_expand, target_step_bytes=64 * 1024))
    ref2 = _reference(x_big, w_reduce, b_reduce, w_expand, b_expand)
    assert jnp.allclose(out2, ref2, atol=1e-5, rtol=1e-5), "tiled mismatch vs reference"

    # 3) Ragged spatial extent (H*W = 100 < 128): no wrapper pad / slice, masked boundary block.
    x_r = jax.random.normal(k_x, (N, C, 10, 10), dtype=jnp.float32)
    out3 = jax.block_until_ready(pw_se(x_r, w_reduce, b_reduce, w_expand, b_expand))
    ref3 = _reference(x_r, w_reduce, b_reduce, w_expand, b_expand)
    assert jnp.allclose(out3, ref3, atol=1e-5, rtol=1e-5), "ragged mismatch vs reference"

    # 4) bf16 activations: bf16 in -> bf16 out, bf16 MXU feeds, no f32 copy of x in the kernel.
    x_bf = x.astype(jnp.bfloat16)
    out_bf = jax.block_until_ready(pw_se(x_bf, w_reduce, b_reduce, w_expand, b_expand))
    ref_bf = _reference(x_bf, w_reduce, b_reduce, w_expand, b_expand)
    assert out_bf.dtype == jnp.bfloat16
    assert jnp.allclose(out_bf.astype(jnp.float32), ref_bf.astype(jnp.float32),
                        atol=2e-2, rtol=2e-2), "bf16 mismatch vs reference"

    print("KERNEL_OK")
</pallas_src>

<mosaic_0001>
module attributes {stable_mosaic.version = 11 : i64} {
  func.func @_pw_se_kernel(%arg0: i32, %arg1: i32, %arg2: memref<32x256xf32, #tpu.memory_space<vmem>>, %arg3: memref<16x32xf32, #tpu.memory_space<vmem>>, %arg4: memref<16x1xf32, #tpu.memory_space<vmem>>, %arg5: memref<32x16xf32, #tpu.memory_space<vmem>>, %arg6: memref<32x1xf32, #tpu.memory_space<vmem>>, %arg7: memref<32x256xf32, #tpu.memory_space<vmem>>) attributes {dimension_semantics = [#tpu.dimension_semantics<parallel>, #tpu.dimension_semantics<parallel>], iteration_bounds = array<i64: 1, 1>, scalar_prefetch = 0 : i64, scratch_operands = 0 : i64, tpu.core_type = #tpu.core_type<tc>, window_params = [{transform_indices = @transform_0, window_bounds = array<i64: 32, 256>}, {pipeline_mode = #tpu.pipeline_mode<synchronous>, transform_indices = @transform_1, window_bounds = array<i64: 16, 32>}, {pipeline_mode = #tpu.pipeline_mode<synchronous>, transform_indices = @transform_2, window_bounds = array<i64: 16, 1>}, {pipeline_mode = #tpu.pipeline_mode<synchronous>, transform_indices = @transform_3, window_bounds = array<i64: 32, 16>}, {pipeline_mode = #tpu.pipeline_mode<synchronous>, transform_indices = @transform_4, window_bounds = array<i64: 32, 1>}, {transform_indices = @transform_5, window_bounds = array<i64: 32, 256>}]} {
    %c0 = arith.constant 0 : index
    %c0_0 = arith.constant 0 : index
    %0 = vector.load %arg2[%c0, %c0_0] : memref<32x256xf32, #tpu.memory_space<vmem>>, vector<32x256xf32>
    %c0_1 = arith.constant 0 : index
    %c0_2 = arith.constant 0 : index
    %1 = vector.load %arg3[%c0_1, %c0_2] : memref<16x32xf32, #tpu.memory_space<vmem>>, vector<16x32xf32>
    %cst = arith.constant dense<0.000000e+00> : vector<16x256xf32>
    %2 = tpu.matmul %1, %0, %cst {dimension_numbers = #tpu.dot_dimension_numbers<[1], [0], [0], [1], [0, 0, 1, 1], [], []>} : vector<16x32xf32>, vector<32x256xf32>, vector<16x256xf32> -> vector<16x256xf32>
    %c0_3 = arith.constant 0 : index
    %c0_4 = arith.constant 0 : index
    %3 = vector.load %arg4[%c0_3, %c0_4] : memref<16x1xf32, #tpu.memory_space<vmem>>, vector<16x1xf32>
    %4 = vector.broadcast %3 : vector<16x1xf32> to vector<16x256xf32>
    %5 = arith.addf %2, %4 : vector<16x256xf32>
    %cst_5 = arith.constant 0.000000e+00 : f32
    %6 = vector.broadcast %cst_5 : f32 to vector<16x256xf32>
    %7 = arith.maximumf %5, %6 : vector<16x256xf32>
    %c0_6 = arith.constant 0 : index
    %c0_7 = arith.constant 0 : index
    %8 = vector.load %arg5[%c0_6, %c0_7] : memref<32x16xf32, #tpu.memory_space<vmem>>, vector<32x16xf32>
    %cst_8 = arith.constant dense<0.000000e+00> : vector<32x256xf32>
    %9 = tpu.matmul %8, %7, %cst_8 {dimension_numbers = #tpu.dot_dimension_numbers<[1], [0], [0], [1], [0, 0, 1, 1], [], []>} : vector<32x16xf32>, vector<16x256xf32>, vector<32x256xf32> -> vector<32x256xf32>
    %c0_9 = arith.constant 0 : index
    %c0_10 = arith.constant 0 : index
    %10 = vector.load %arg6[%c0_9, %c0_10] : memref<32x1xf32, #tpu.memory_space<vmem>>, vector<32x1xf32>
    %11 = vector.broadcast %10 : vector<32x1xf32> to vector<32x256xf32>
    %12 = arith.addf %9, %11 : vector<32x256xf32>
    %cst_11 = arith.constant 5.000000e-01 : f32
    %13 = vector.broadcast %cst_11 : f32 to vector<32x256xf32>
    %14 = arith.mulf %13, %12 : vector<32x256xf32>
    %15 = math.tanh %14 : vector<32x256xf32>
    %cst_12 = arith.constant 1.000000e+00 : f32
    %16 = vector.broadcast %cst_12 : f32 to vector<32x256xf32>
    %17 = arith.addf %15, %16 : vector<32x256xf32>
    %cst_13 = arith.constant 5.000000e-01 : f32
    %18 = vector.broadcast %cst_13 : f32 to vector<32x256xf32>
    %19 = arith.mulf %18, %17 : vector<32x256xf32>
    %20 = arith.mulf %0, %19 : vector<32x256xf32>
    %c0_14 = arith.constant 0 : index
    %c0_15 = arith.constant 0 : index
    %21 = vector.load %arg7[%c0_14, %c0_15] : memref<32x256xf32, #tpu.memory_space<vmem>>, vector<32x256xf32>
    tpu.vector_store %arg7[%c0_14, %c0_15], %20 {strides = array<i32>} : memref<32x256xf32, #tpu.memory_space<vmem>>, vector<32x256xf32>,
    return
  }
  func.func @transform_0(%arg0: i32, %arg1: i32) -> (i32, i32) {
    %c0_i32 = arith.constant 0 : i32
    return %arg0, %arg1 : i32, i32
  }
  func.func @transform_1(%arg0: i32, %arg1: i32) -> (i32, i32) {
    %c0_i32 = arith.constant 0 : i32
    %c0_i32_0 = arith.constant 0 : i32
    %c0_i32_1 = arith.constant 0 : i32
    return %c0_i32, %c0_i32_0 : i32, i32
  }
  func.func @transform_2(%arg0: i32, %arg1: i32) -> (i32, i32) {
    %c0_i32 = arith.constant 0 : i32
    %c0_i32_0 = arith.constant 0 : i32
    %c0_i32_1 = arith.constant 0 : i32
    return %c0_i32, %c0_i32_0 : i32, i32
  }
  func.func @transform_3(%arg0: i32, %arg1: i32) -> (i32, i32) {
    %c0_i32 = arith.constant 0 : i32
    %c0_i32_0 = arith.constant 0 : i32
    %c0_i32_1 = arith.constant 0 : i32
    return %c0_i32, %c0_i32_0 : i32, i32
  }
  func.func @transform_4(%arg0: i32, %arg1: i32) -> (i32, i32) {
    %c0_i32 = arith.constant 0 : i32
    %c0_i32_0 = arith.constant 0 : i32
    %c0_i32_1 = arith.constant 0 : i32
    return %c0_i32, %c0_i32_0 : i32, i32
  }
  func.func @transform_5(%arg0: i32, %arg1: i32) -> (i32, i32) {
    %c0_i32 = arith.constant 0 : i32
    return %arg0, %arg1 : i32, i32
  }
}

</mosaic_0001>

<bundles_post_ra>
// kernel: tile.13
= control target key start
LH: loop header
LB: loop body
LE: loop exit
PB: predicated region body
PF: predicated region fallthrough
CT: control target
= control target key end

     0   :  { %s22_s0 = inlined_call_operand.vmem [shape: f32[8], index: 0, kind: input, shape index: {}]   ;;  %s23_s1 = inlined_call_operand.vmem [shape: f32[2,8], index: 1, kind: output, shape index: {}]  }
   0x1   :  { %v4_v0 = vld [vmem:[%s22_s0] ss:$0 sm:$0xff] }
   0x2   :  { %5 = vst [vmem:[%s23_s1] sm:$0x3] %v4_v0 }

// kernel: tile.17
= control target key start
LH: loop header
LB: loop body
LE: loop exit
PB: predicated region body
PF: predicated region fallthrough
CT: control target
= control target key end

     0   :  { %s22_s0 = inlined_call_operand.vmem [shape: f32[16], index: 0, kind: input, shape index: {}]   ;;  %s23_s1 = inlined_call_operand.vmem [shape: f32[2,16], index: 1, kind: output, shape index: {}]  }
   0x1   :  { %v4_v0 = vld [vmem:[%s22_s0] ss:$0 sm:$0xff] }
   0x2   :  { %5 = vst [vmem:[%s23_s1] sm:$0x3] %v4_v0 }

// kernel: tile.0
= control target key start
LH: loop header
LB: loop body
LE: loop exit
PB: predicated region body
PF: predicated region fallthrough
CT: control target
= control target key end

     0   :  { %s66_s8 = smov 125   ;;  %vm7_vm0 = vcmask 7168   ;;  %s67_s11 = smov 126   ;;  %s117_s0 = inlined_call_operand.vmem [shape: f32[2,8], index: 0, kind: input, shape index: {}]   ;;  %s118_s1 = inlined_call_operand.vmem [shape: f32[16,1], index: 1, kind: output, shape index: {}]  }
   0x1   :  { %v4_v0 = vld [vmem:[%s117_s0] sm:$0x3]  ;;  %s65_s0 = smov 127   ;;  %s68_s12 = smov 124  }
   0x2   :  { %5 = vst [vmem:[#allocation0] sm:$0x3] %v4_v0  ;;  %s69_s13 = smov 123   ;;  %s70_s14 = smov 122  }
   0x3   :  { %s71_s15 = smov 121  }
   0x9   :  { %v9_v1 = vld [vmem:[#allocation0] sm:$0x3]  }
   0xa   :  { %v21_v2 = vld [vmem:[#allocation0] sm:$0x3]   ;;  %10 = vrot.lane.b32.xlu0 %v9_v1, %s65_s0 }
   0xb   :  { %22 = vrot.lane.b32.xlu1 %v21_v2, %s66_s8  ;;  %v15_v3 = vld [vmem:[#allocation0] sm:$0x3]  }
   0xc   :  { %v27_v4 = vld [vmem:[#allocation0] sm:$0x3]  }
   0xd   :  { %v6_v5 = vld [vmem:[#allocation0] sm:$0x3]  }
   0xe   :  { %8 = vst.msk [vmem:[%s118_s1] ss:$8 sm:$0x3] %vm7_vm0, %v6_v5   ;;  %16 = vrot.lane.b32.xlu0 %v15_v3, %s67_s11  ;;  %v33_v6 = vld [vmem:[#allocation0] sm:$0x3]  }
   0xf   :  { %28 = vrot.lane.b32.xlu1 %v27_v4, %s68_s12  ;;  %v39_v7 = vld [vmem:[#allocation0] sm:$0x3]  }
  0x10   :  { %v45_v8 = vld [vmem:[#allocation0] sm:$0x3]  }
  0x12   :  { %34 = vrot.lane.b32.xlu0 %v33_v6, %s69_s13 }
  0x13   :  { %40 = vrot.lane.b32.xlu1 %v39_v7, %s70_s14 }
  0x16   :  { %46 = vrot.lane.b32.xlu0 %v45_v8, %s71_s15 }
  0x7c   :  { %v11_v9 = vpop.permute.xlu0 %10  }
  0x7d   :  { %v23_v10 = vpop.permute.xlu1 %22   ;;  %51 = vst.msk [vmem:[%s118_s1 + $0x1] ss:$8 sm:$0x3] %vm7_vm0, %v11_v9  }
  0x7e   :  { %53 = vst.msk [vmem:[%s118_s1 + $0x3] ss:$8 sm:$0x3] %vm7_vm0, %v23_v10  }
  0x80   :  { %v17_v11 = vpop.permute.xlu0 %16  }
  0x81   :  { %v29_v12 = vpop.permute.xlu1 %28   ;;  %52 = vst.msk [vmem:[%s118_s1 + $0x2] ss:$8 sm:$0x3] %vm7_vm0, %v17_v11  }
  0x82   :  { %54 = vst.msk [vmem:[%s118_s1 + $0x4] ss:$8 sm:$0x3] %vm7_vm0, %v29_v12  }
  0x84   :  { %v35_v13 = vpop.permute.xlu0 %34  }
  0x85   :  { %v41_v14 = vpop.permute.xlu1 %40   ;;  %55 = vst.msk [vmem:[%s118_s1 + $0x5] ss:$8 sm:$0x3] %vm7_vm0, %v35_v13  }
  0x86   :  { %56 = vst.msk [vmem:[%s118_s1 + $0x6] ss:$8 sm:$0x3] %vm7_vm0, %v41_v14  }
  0x88   :  { %v47_v15 = vpop.permute.xlu0 %46  }
  0x89   :  { %57 = vst.msk [vmem:[%s118_s1 + $0x7] ss:$8 sm:$0x3] %vm7_vm0, %v47_v15  }

// kernel: tile.1
= control target key start
LH: loop header
LB: loop body
LE: loop exit
PB: predicated region body
PF: predicated region fallthrough
CT: control target
= control target key end

     0   :  { %s130_s8 = smov 125   ;;  %s131_s9 = smov 126   ;;  %vm7_vm0 = vcmask 7168   ;;  %s221_s0 = inlined_call_operand.vmem [shape: f32[2,16], index: 0, kind: input, shape index: {}]   ;;  %s222_s1 = inlined_call_operand.vmem [shape: f32[32,1], index: 1, kind: output, shape index: {}]  }
   0x1   :  { %v4_v0 = vld [vmem:[%s221_s0] sm:$0x3]  ;;  %s129_s0 = smov 127   ;;  %s132_s10 = smov 124  }
   0x2   :  { %5 = vst [vmem:[#allocation0] sm:$0x3] %v4_v0  ;;  %s133_s11 = smov 123   ;;  %s134_s12 = smov 122  }
   0x3   :  { %s135_s13 = smov 121   ;;  %s136_s14 = smov 120  }
   0x4   :  { %s137_s17 = smov 119   ;;  %s138_s18 = smov 118  }
   0x5   :  { %s139_s19 = smov 117   ;;  %s140_s20 = smov 116  }
   0x6   :  { %s141_s21 = smov 115   ;;  %s142_s22 = smov 114  }
   0x7   :  { %s143_s23 = smov 113  }
   0x9   :  { %v9_v1 = vld [vmem:[#allocation0] sm:$0x3]  }
   0xa   :  { %v21_v2 = vld [vmem:[#allocation0] sm:$0x3]   ;;  %10 = vrot.lane.b32.xlu0 %v9_v1, %s129_s0 }
   0xb   :  { %22 = vrot.lane.b32.xlu1 %v21_v2, %s130_s8  ;;  %v15_v3 = vld [vmem:[#allocation0] sm:$0x3]  }
   0xc   :  { %v27_v4 = vld [vmem:[#allocation0] sm:$0x3]  }
   0xd   :  { %v33_v5 = vld [vmem:[#allocation0] sm:$0x3]  }
   0xe   :  { %16 = vrot.lane.b32.xlu0 %v15_v3, %s131_s9  ;;  %v39_v6 = vld [vmem:[#allocation0] sm:$0x3]  }
   0xf   :  { %28 = vrot.lane.b32.xlu1 %v27_v4, %s132_s10  ;;  %v45_v7 = vld [vmem:[#allocation0] sm:$0x3]  }
  0x10   :  { %v51_v8 = vld [vmem:[#allocation0] sm:$0x3]  }
  0x11   :  { %v57_v9 = vld [vmem:[#allocation0] sm:$0x3]  }
  0x12   :  { %34 = vrot.lane.b32.xlu0 %v33_v5, %s133_s11  ;;  %v63_v10 = vld [vmem:[#allocation0] sm:$0x3]  }
  0x13   :  { %40 = vrot.lane.b32.xlu1 %v39_v6, %s134_s12  ;;  %v6_v11 = vld [vmem:[#allocation0] sm:$0x3]  }
  0x14   :  { %8 = vst.msk [vmem:[%s222_s1] ss:$16 sm:$0x3] %vm7_vm0, %v6_v11   ;;  %v69_v12 = vld [vmem:[#allocation0] sm:$0x3]  }
  0x15   :  { %v75_v13 = vld [vmem:[#allocation0] sm:$0x3]  }
  0x16   :  { %46 = vrot.lane.b32.xlu0 %v45_v7, %s135_s13  ;;  %v81_v14 = vld [vmem:[#allocation0] sm:$0x3]  }
  0x17   :  { %52 = vrot.lane.b32.xlu1 %v51_v8, %s136_s14  ;;  %v87_v15 = vld [vmem:[#allocation0] sm:$0x3]  }
  0x18   :  { %v93_v16 = vld [vmem:[#allocation0] sm:$0x3]  }
  0x1a   :  { %58 = vrot.lane.b32.xlu0 %v57_v9, %s137_s17 }
  0x1b   :  { %64 = vrot.lane.b32.xlu1 %v63_v10, %s138_s18 }
  0x1e   :  { %70 = vrot.lane.b32.xlu0 %v69_v12, %s139_s19 }
  0x1f   :  { %76 = vrot.lane.b32.xlu1 %v75_v13, %s140_s20 }
  0x22   :  { %82 = vrot.lane.b32.xlu0 %v81_v14, %s141_s21 }
  0x23   :  { %88 = vrot.lane.b32.xlu1 %v87_v15, %s142_s22 }
  0x26   :  { %94 = vrot.lane.b32.xlu0 %v93_v16, %s143_s23 }
  0x7c   :  { %v11_v17 = vpop.permute.xlu0 %10  }
  0x7d   :  { %v23_v18 = vpop.permute.xlu1 %22   ;;  %99 = vst.msk [vmem:[%s222_s1 + $0x1] ss:$16 sm:$0x3] %vm7_vm0, %v11_v17  }
  0x7e   :  { %101 = vst.msk [vmem:[%s222_s1 + $0x3] ss:$16 sm:$0x3] %vm7_vm0, %v23_v18  }
  0x80   :  { %v17_v19 = vpop.permute.xlu0 %16  }
  0x81   :  { %v29_v20 = vpop.permute.xlu1 %28   ;;  %100 = vst.msk [vmem:[%s222_s1 + $0x2] ss:$16 sm:$0x3] %vm7_vm0, %v17_v19  }
  0x82   :  { %102 = vst.msk [vmem:[%s222_s1 + $0x4] ss:$16 sm:$0x3] %vm7_vm0, %v29_v20  }
  0x84   :  { %v35_v21 = vpop.permute.xlu0 %34  }
  0x85   :  { %v41_v22 = vpop.permute.xlu1 %40   ;;  %103 = vst.msk [vmem:[%s222_s1 + $0x5] ss:$16 sm:$0x3] %vm7_vm0, %v35_v21  }
  0x86   :  { %104 = vst.msk [vmem:[%s222_s1 + $0x6] ss:$16 sm:$0x3] %vm7_vm0, %v41_v22  }
  0x88   :  { %v47_v23 = vpop.permute.xlu0 %46  }
  0x89   :  { %v53_v24 = vpop.permute.xlu1 %52   ;;  %105 = vst.msk [vmem:[%s222_s1 + $0x7] ss:$16 sm:$0x3] %vm7_vm0, %v47_v23  }
  0x8a   :  { %106 = vst.msk [vmem:[%s222_s1 + $0x8] ss:$16 sm:$0x3] %vm7_vm0, %v53_v24  }
  0x8c   :  { %v59_v25 = vpop.permute.xlu0 %58  }
  0x8d   :  { %v65_v26 = vpop.permute.xlu1 %64   ;;  %107 = vst.msk [vmem:[%s222_s1 + $0x9] ss:$16 sm:$0x3] %vm7_vm0, %v59_v25  }
  0x8e   :  { %108 = vst.msk [vmem:[%s222_s1 + $0xa] ss:$16 sm:$0x3] %vm7_vm0, %v65_v26  }
  0x90   :  { %v71_v27 = vpop.permute.xlu0 %70  }
  0x91   :  { %v77_v28 = vpop.permute.xlu1 %76   ;;  %109 = vst.msk [vmem:[%s222_s1 + $0xb] ss:$16 sm:$0x3] %vm7_vm0, %v71_v27  }
  0x92   :  { %110 = vst.msk [vmem:[%s222_s1 + $0xc] ss:$16 sm:$0x3] %vm7_vm0, %v77_v28  }
  0x94   :  { %v83_v29 = vpop.permute.xlu0 %82  }
  0x95   :  { %v89_v30 = vpop.permute.xlu1 %88   ;;  %111 = vst.msk [vmem:[%s222_s1 + $0xd] ss:$16 sm:$0x3] %vm7_vm0, %v83_v29  }
  0x96   :  { %112 = vst.msk [vmem:[%s222_s1 + $0xe] ss:$16 sm:$0x3] %vm7_vm0, %v89_v30  }
  0x98   :  { %v95_v31 = vpop.permute.xlu0 %94  }
  0x99   :  { %113 = vst.msk [vmem:[%s222_s1 + $0xf] ss:$16 sm:$0x3] %vm7_vm0, %v95_v31  }

// kernel: pw_squeeze_excite.1
= control target key start
LH: loop header
LB: loop body
LE: loop exit
PB: predicated region body
PF: predicated region fallthrough
CT: control target
= control target key end

     0   :  { %v350_v3 = vmov 0.0   ;;  %v351_v4 = vmov 0   ;;  %vm42_vm0 = vcmask 261120   ;;  %vm158_vm1 = vcmask 130048   ;;  %s504_s0 = inlined_call_operand.vmem [shape: f32[32,256], index: 0, kind: input, shape index: {}]   ;;  %s505_s2 = inlined_call_operand.vmem [shape: f32[16,1], index: 2, kind: input, shape index: {}]   ;;  %s506_s1 = inlined_call_operand.vmem [shape: f32[16,32], index: 1, kind: input, shape index: {}]   ;;  %s507_s4 = inlined_call_operand.vmem [shape: f32[32,1], index: 4, kind: input, shape index: {}]   ;;  %s508_s3 = inlined_call_operand.vmem [shape: f32[32,16], index: 3, kind: input, shape index: {}]   ;;  %s509_s5 = inlined_call_operand.vmem [shape: f32[32,256], index: 5, kind: output, shape index: {}]  }
   0x1   :  { %v385_v0 = vld [vmem:[%s504_s0 + $0x8] sm:$0xff]  ;;  %v390_v1 = vld [vmem:[%s504_s0 + $0x18] sm:$0xff]  ;;  %v395_v2 = vld [vmem:[%s504_s0] sm:$0xff]  ;;  %113 = vmatprep.mubr.f32.mxu0 %v350_v3  ;;  %332 = vset.pattern.permute.xlu0 %v351_v4 }
   0x2   :  { %v318_v5 = vpack.c.bf16 %v390_v1, %v385_v0  ;;  %v403_v6 = vld [vmem:[%s504_s0 + $0x10] sm:$0xff]  ;;  %v408_v7 = vld [vmem:[%s504_s0 + $0x28] sm:$0xff]  ;;  %v413_v8 = vld [vmem:[%s504_s0 + $0x38] sm:$0xff]  ;;  %235 = vmatprep.mubr.f32.mxu1 %v350_v3  ;;  %333 = vset.pattern.permute.xlu1 %v351_v4 }
   0x3   :  { %v320_v9 = vpack.c.bf16 %v403_v6, %v395_v2  ;;  %v322_v10 = vpack.c.bf16 %v413_v8, %v408_v7  ;;  %v423_v11 = vld [vmem:[%s504_s0 + $0x20] sm:$0xff]  ;;  %v428_v12 = vld [vmem:[%s504_s0 + $0x30] sm:$0xff]  ;;  %v31_v15 = vld [vmem:[%s505_s2 + $0x8] sm:$0xff] }
   0x4   :  { %319 = vmatprep.subr.bf16.mxu0 %v318_v5  ;;  %v30_v13 = vld [vmem:[%s505_s2] sm:$0xff]  ;;  %v324_v14 = vpack.c.bf16 %v428_v12, %v423_v11  ;;  %v136_v17 = vld [vmem:[%s507_s4 + $0x10] sm:$0xff]  ;;  %v29_v18 = vld [vmem:[%s506_s1 + $0x8] sm:$0xff] }
   0x5   :  { %321 = vmatpush1.bf16.msra.mxu0 %v320_v9  ;;  %34 = vperm.xlu0 %332, %v30_v13   ;;  %v28_v16 = vld [vmem:[%s506_s1] sm:$0xff]  ;;  %v135_v20 = vld [vmem:[%s507_s4 + $0x8] sm:$0xff]  ;;  %v137_v21 = vld [vmem:[%s507_s4 + $0x18] sm:$0xff] }
   0x6   :  { %323 = vmatprep.subr.bf16.mxu0 %v322_v10  ;;  %v134_v19 = vld [vmem:[%s507_s4] sm:$0xff]  ;;  %v131_v39 = vld [vmem:[%s508_s3 + $0x8] sm:$0xff]  ;;  %v132_v40 = vld [vmem:[%s508_s3 + $0x10] sm:$0xff] }
   0x7   :  { %140 = vperm.xlu1 %333, %v134_v19   ;;  %v130_v38 = vld [vmem:[%s508_s3] sm:$0xff]  ;;  %v133_v41 = vld [vmem:[%s508_s3 + $0x18] sm:$0xff] }
   0x9   :  { %325 = vmatpush1.bf16.msra.mxu0 %v324_v14  ;;  %39 = vperm.xlu0 %332, %v31_v15  }
   0xb   :  { %145 = vperm.xlu1 %333, %v135_v20  }
   0xc   :  { %312 = vmatmul.mubr.msk.f32.vlgmr.msra.gmra.mrb[0].mxu0 %vm42_vm0, %v28_v16 }
   0xd   :  { %119 = vmatprep.mubr.f32.mxu0 %v350_v3  ;;  %150 = vperm.xlu0 %332, %v136_v17  }
   0xf   :  { %155 = vperm.xlu1 %333, %v137_v21  }
  0x10   :  { %313 = vmatmul.mubr.msk.f32.gmra.mrb[2].mxu0 %vm42_vm0, %v29_v18 }
  0x84   :  { %v35_v22 = vpop.permute.xlu0 %34 }
  0x86   :  { %v141_v42 = vpop.permute.xlu1 %140 }
  0x88   :  { %v40_v26 = vpop.permute.xlu0 %39 }
  0x8a   :  { %v146_v48 = vpop.permute.xlu1 %145 }
  0x8c   :  { %v151_v55 = vpop.permute.xlu0 %150 }
  0x8e   :  { %v156_v62 = vpop.permute.xlu1 %155 }
  0xdf   :  { %v115_v23 = vpop.f32.mrb[0].mxu0 }
  0xe0   :  { %v117_v24 = vpop.f32.mrb[1].mxu0  ;;  %v116_v25 = vadd.f32 %v115_v23, %v35_v22 }
  0xe1   :  { %v118_v27 = vadd.f32 %v117_v24, %v35_v22 }
  0xe2   :  { %v126_v32 = vmax.f32 %v116_v25, 0.0 }
  0xe3   :  { %v121_v28 = vpop.f32.mrb[2].mxu0  ;;  %v127_v34 = vmax.f32 %v118_v27, 0.0 }
  0xe4   :  { %v122_v29 = vadd.f32 %v121_v28, %v40_v26  ;;  %v123_v30 = vpop.f32.mrb[3].mxu0 }
  0xe5   :  { %v124_v31 = vadd.f32 %v123_v30, %v40_v26 }
  0xe6   :  { %v128_v33 = vmax.f32 %v122_v29, 0.0 }
  0xe7   :  { %v129_v35 = vmax.f32 %v124_v31, 0.0 }
  0xe8   :  { %v328_v36 = vpack.c.bf16 %v128_v33, %v126_v32 }
  0xe9   :  { %v326_v37 = vpack.c.bf16 %v129_v35, %v127_v34 }
  0xeb   :  { %327 = vmatprep.subr.bf16.mxu1 %v326_v37 }
  0xec   :  { %329 = vmatpush1.bf16.msra.mxu1 %v328_v36 }
  0xef   :  { %314 = vmatmul.mubr.msk.f32.vlgmr.msra.gmra.mrb[0].mxu1 %vm158_vm1, %v130_v38 }
  0xf0   :  { %241 = vmatprep.mubr.f32.mxu1 %v350_v3 }
  0xf3   :  { %315 = vmatmul.mubr.msk.f32.gmra.mrb[2].mxu1 %vm158_vm1, %v131_v39 }
  0xf4   :  { %247 = vmatprep.mubr.f32.mxu1 %v350_v3 }
  0xf7   :  { %316 = vmatmul.mubr.msk.f32.gmra.mrb[4].mxu1 %vm158_vm1, %v132_v40 }
  0xf8   :  { %253 = vmatprep.mubr.f32.mxu1 %v350_v3 }
  0xfb   :  { %317 = vmatmul.mubr.msk.f32.gmra.mrb[6].mxu1 %vm158_vm1, %v133_v41 }
 0x1c2   :  { %v237_v43 = vpop.f32.mrb[0].mxu1 }
 0x1c3   :  { %v238_v44 = vadd.f32 %v237_v43, %v141_v42  ;;  %v239_v45 = vpop.f32.mrb[1].mxu1 }
 0x1c4   :  { %v240_v46 = vadd.f32 %v239_v45, %v141_v42 }
 0x1c5   :  { %v260_v47 = vmul.f32 0.5, %v238_v44 }
 0x1c6   :  { %v261_v49 = vmul.f32 0.5, %v240_v46  ;;  %v243_v50 = vpop.f32.mrb[2].mxu1 }
 0x1c7   :  { %334 = vtanh.f32 %v260_v47  ;;  %v244_v51 = vadd.f32 %v243_v50, %v146_v48  ;;  %v245_v52 = vpop.f32.mrb[3].mxu1 }
 0x1c8   :  { %336 = vtanh.f32 %v261_v49  ;;  %v246_v53 = vadd.f32 %v245_v52, %v146_v48 }
 0x1c9   :  { %v262_v54 = vmul.f32 0.5, %v244_v51 }
 0x1ca   :  { %v263_v56 = vmul.f32 0.5, %v246_v53  ;;  %v249_v57 = vpop.f32.mrb[4].mxu1 }
 0x1cb   :  { %338 = vtanh.f32 %v262_v54  ;;  %v250_v58 = vadd.f32 %v249_v57, %v151_v55  ;;  %v251_v59 = vpop.f32.mrb[5].mxu1 }
 0x1cc   :  { %340 = vtanh.f32 %v263_v56  ;;  %v252_v60 = vadd.f32 %v251_v59, %v151_v55 }
 0x1cd   :  { %v264_v61 = vmul.f32 0.5, %v250_v58 }
 0x1ce   :  { %v265_v63 = vmul.f32 0.5, %v252_v60  ;;  %v255_v3 = vpop.f32.mrb[6].mxu1 }
 0x1cf   :  { %342 = vtanh.f32 %v264_v61  ;;  %v256_v4 = vadd.f32 %v255_v3, %v156_v62  ;;  %v257_v5 = vpop.f32.mrb[7].mxu1 }
 0x1d0   :  { %344 = vtanh.f32 %v265_v63  ;;  %v258_v9 = vadd.f32 %v257_v5, %v156_v62 }
 0x1d1   :  { %v335_v10 = vpop.eup %334  ;;  %v266_v13 = vmul.f32 0.5, %v256_v4 }
 0x1d2   :  { %v337_v14 = vpop.eup %336  ;;  %v276_v15 = vadd.f32 1.0, %v335_v10  ;;  %v267_v16 = vmul.f32 0.5, %v258_v9 }
 0x1d3   :  { %v277_v17 = vadd.f32 1.0, %v337_v14  ;;  %346 = vtanh.f32 %v266_v13 }
 0x1d4   :  { %v284_v18 = vmul.f32 0.5, %v276_v15  ;;  %348 = vtanh.f32 %v267_v16 }
 0x1d5   :  { %v339_v19 = vpop.eup %338  ;;  %v285_v20 = vmul.f32 0.5, %v277_v17 }
 0x1d6   :  { %v341_v21 = vpop.eup %340  ;;  %v292_v22 = vmul.f32 %v284_v18, %v395_v2  ;;  %v278_v23 = vadd.f32 1.0, %v339_v19 }
 0x1d7   :  { %v293_v24 = vmul.f32 %v285_v20, %v385_v0  ;;  %v279_v25 = vadd.f32 1.0, %v341_v21 }
 0x1d8   :  { %300 = vst [vmem:[%s509_s5] sm:$0xff] %v292_v22  ;;  %v286_v26 = vmul.f32 0.5, %v278_v23 }
 0x1d9   :  { %v343_v27 = vpop.eup %342  ;;  %301 = vst [vmem:[%s509_s5 + $0x8] sm:$0xff] %v293_v24  ;;  %v287_v28 = vmul.f32 0.5, %v279_v25 }
 0x1da   :  { %v345_v29 = vpop.eup %344  ;;  %v294_v30 = vmul.f32 %v286_v26, %v403_v6  ;;  %v280_v31 = vadd.f32 1.0, %v343_v27 }
 0x1db   :  { %v295_v2 = vmul.f32 %v287_v28, %v390_v1  ;;  %v281_v32 = vadd.f32 1.0, %v345_v29 }
 0x1dc   :  { %302 = vst [vmem:[%s509_s5 + $0x10] sm:$0xff] %v294_v30  ;;  %v288_v0 = vmul.f32 0.5, %v280_v31 }
 0x1dd   :  { %v347_v33 = vpop.eup %346  ;;  %303 = vst [vmem:[%s509_s5 + $0x18] sm:$0xff] %v295_v2  ;;  %v289_v34 = vmul.f32 0.5, %v281_v32 }
 0x1de   :  { %v349_v35 = vpop.eup %348  ;;  %v296_v36 = vmul.f32 %v288_v0, %v423_v11  ;;  %v282_v37 = vadd.f32 1.0, %v347_v33 }
 0x1df   :  { %v297_v6 = vmul.f32 %v289_v34, %v408_v7  ;;  %v283_v38 = vadd.f32 1.0, %v349_v35 }
 0x1e0   :  { %304 = vst [vmem:[%s509_s5 + $0x20] sm:$0xff] %v296_v36  ;;  %v290_v1 = vmul.f32 0.5, %v282_v37 }
 0x1e1   :  { %305 = vst [vmem:[%s509_s5 + $0x28] sm:$0xff] %v297_v6  ;;  %v291_v39 = vmul.f32 0.5, %v283_v38 }
 0x1e2   :  { %v298_v40 = vmul.f32 %v290_v1, %v428_v12 }
 0x1e3   :  { %v299_v41 = vmul.f32 %v291_v39, %v413_v8 }
 0x1e4   :  { %306 = vst [vmem:[%s509_s5 + $0x30] sm:$0xff] %v298_v40 }
 0x1e5   :  { %307 = vst [vmem:[%s509_s5 + $0x38] sm:$0xff] %v299_v41 }

</bundles_post_ra>
